<compile_context>
chip_gen: v7x
topology: tpu7x:2x2x1
jax: 0.10.0
libtpu: 0.0.40
codegen_flags: <defaults>
</compile_context>

<pallas_src>
import jax
import jax.numpy as jnp
from jax import lax
from jax.experimental import pallas as pl
from jax.experimental.pallas import tpu as pltpu


def _round_up(x, m):
    return (x + m - 1) // m * m


def _conv_kernel(xc_ref, w_ref, b_ref, o_ref):
    # xc_ref: (TP, Kp)   im2col patch rows for this (batch, P-tile)   [bf16]
    # w_ref : (Kp, TC)   fused conv weight (9 taps stacked on K)      [bf16]
    # b_ref : (1, TC)    bias                                          [f32]
    # o_ref : (TP, TC)   output tile                                   [f32]
    acc = jnp.dot(xc_ref[...], w_ref[...], preferred_element_type=jnp.float32)
    o_ref[...] = (acc + b_ref[...]).astype(o_ref.dtype)


def downsample_layer(x_nchw, weight, bias, *, tp_rows=512,
                     compute_dtype=jnp.bfloat16):
    """Conv2d(in_ch, out_ch, kernel_size=3, stride=2, padding=1).

    x_nchw: (B, Cin, H, W) float32
    weight: (Cout, Cin, 3, 3) float32 (PyTorch OIHW layout)
    bias:   (Cout,) float32
    returns (B, Cout, Ho, Wo) with Ho = (H + 2 - 3)//2 + 1, Wo likewise.
    """
    b, cin, h, w = x_nchw.shape
    cout = weight.shape[0]
    ho = (h + 2 * 1 - 3) // 2 + 1
    wo = (w + 2 * 1 - 3) // 2 + 1
    p = ho * wo
    k = 9 * cin

    # Padded sizes: lane-dense output (Cout -> mult of 128), bf16-packed
    # contraction dim (K -> mult of 16), P padded to a multiple of 8.
    kp = _round_up(k, 16)
    coutp = _round_up(cout, 128)
    pp = _round_up(p, 8)

    # Cout tile (lane dim) and P tile (sublane dim); shrink the P tile until
    # the double-buffered working set fits a conservative VMEM budget that is
    # safe on v5e/v6e (128 MiB) and v7x (64 MiB per TC).
    tc = min(coutp, 256)
    budget = 20 * 1024 * 1024
    tp = min(_round_up(tp_rows, 8), pp)
    while tp > 8:
        need = 2 * (tp * kp * 2 + kp * tc * 2 + tc * 4 + tp * tc * 4)
        if need <= budget:
            break
        tp = max(8, _round_up(tp // 2, 8))
    grid_p = pl.cdiv(pp, tp)
    grid_c = coutp // tc
    pp_total = grid_p * tp

    # ---- XLA glue (pure data movement): NCHW -> NHWC, bf16, pad, im2col ----
    x_nhwc = jnp.transpose(x_nchw, (0, 2, 3, 1)).astype(compute_dtype)
    x_pad = jnp.pad(x_nhwc, ((0, 0), (1, 1), (1, 1), (0, 0)))
    patches = []
    for kh in range(3):
        for kw in range(3):
            patches.append(
                x_pad[:, kh:kh + 2 * ho:2, kw:kw + 2 * wo:2, :].reshape(b, p, cin)
            )
    # (B, P, 9*Cin); K ordering is (kh, kw, cin), matching the weight reshape.
    xc = jnp.concatenate(patches, axis=-1)
    xc = jnp.pad(xc, ((0, 0), (0, pp_total - p), (0, kp - k)))

    # weight (Cout, Cin, 3, 3) -> (3, 3, Cin, Cout) -> (9*Cin, Cout), pad, cast.
    w_mat = jnp.transpose(weight, (2, 3, 1, 0)).reshape(k, cout)
    w_mat = jnp.pad(w_mat, ((0, kp - k), (0, coutp - cout))).astype(compute_dtype)
    b2d = jnp.pad(bias.reshape(1, cout).astype(jnp.float32),
                  ((0, 0), (0, coutp - cout)))

    out_padded = pl.pallas_call(
        _conv_kernel,
        out_shape=jax.ShapeDtypeStruct((b, pp_total, coutp), jnp.float32),
        grid_spec=pltpu.PrefetchScalarGridSpec(
            num_scalar_prefetch=0,
            # Cout tile is the innermost axis -> the patch tile's block index
            # is unchanged across it, so it is not re-fetched per Cout tile.
            grid=(b, grid_p, grid_c),
            in_specs=[
                # batch dim squeezed -> kernel sees 2-D (TP, Kp) tiles
                pl.BlockSpec((None, tp, kp), lambda ib, jp, jc: (ib, jp, 0)),
                pl.BlockSpec((kp, tc), lambda ib, jp, jc: (0, jc)),
                pl.BlockSpec((1, tc), lambda ib, jp, jc: (0, jc)),
            ],
            out_specs=pl.BlockSpec((None, tp, tc), lambda ib, jp, jc: (ib, jp, jc)),
        ),
        compiler_params=pltpu.CompilerParams(
            dimension_semantics=("parallel", "parallel", "parallel"),
            vmem_limit_bytes=48 * 1024 * 1024,
        ),
    )(xc, w_mat, b2d)

    # Strip P / Cout padding, reshape back to NCHW.
    out = out_padded[:, :p, :cout].astype(x_nchw.dtype)
    return jnp.transpose(out.reshape(b, ho, wo, cout), (0, 3, 1, 2))


if __name__ == "__main__":
    B, Cin, Cout, H, W = 2, 4, 8, 16, 16

    key = jax.random.PRNGKey(0)
    kx, kw, kb = jax.random.split(key, 3)

    x = jax.random.normal(kx, (B, Cin, H, W), dtype=jnp.float32)

    # Deterministic PyTorch-style init: U(-1/sqrt(fan_in), 1/sqrt(fan_in))
    fan_in = Cin * 3 * 3
    bound = 1.0 / (fan_in ** 0.5)
    weight = jax.random.uniform(
        kw, (Cout, Cin, 3, 3), minval=-bound, maxval=bound, dtype=jnp.float32
    )
    bias = jax.random.uniform(
        kb, (Cout,), minval=-bound, maxval=bound, dtype=jnp.float32
    )

    out = jax.jit(downsample_layer)(x, weight, bias)
    out = jax.block_until_ready(out)

    # Reference: XLA conv on bf16-rounded operands (the kernel's matmul runs
    # in bf16 with f32 accumulation), bias added in f32.
    x_r = x.astype(jnp.bfloat16).astype(jnp.float32)
    w_r = weight.astype(jnp.bfloat16).astype(jnp.float32)
    ref = lax.conv_general_dilated(
        x_r, w_r,
        window_strides=(2, 2),
        padding=((1, 1), (1, 1)),
        dimension_numbers=("NCHW", "OIHW", "NCHW"),
    ) + bias.reshape(1, Cout, 1, 1)

    assert out.shape == (B, Cout, 8, 8)
    assert jnp.allclose(out, ref, atol=2e-3, rtol=2e-3), float(
        jnp.max(jnp.abs(out - ref))
    )

    print("KERNEL_OK")
</pallas_src>

<mosaic_0001>
module attributes {stable_mosaic.version = 11 : i64} {
  func.func @_conv_kernel(%arg0: i32, %arg1: i32, %arg2: i32, %arg3: memref<1x64x48xbf16, #tpu.memory_space<vmem>>, %arg4: memref<48x128xbf16, #tpu.memory_space<vmem>>, %arg5: memref<1x128xf32, #tpu.memory_space<vmem>>, %arg6: memref<1x64x128xf32, #tpu.memory_space<vmem>>) attributes {dimension_semantics = [#tpu.dimension_semantics<parallel>, #tpu.dimension_semantics<parallel>, #tpu.dimension_semantics<parallel>], iteration_bounds = array<i64: 2, 1, 1>, scalar_prefetch = 0 : i64, scratch_operands = 0 : i64, tpu.core_type = #tpu.core_type<tc>, window_params = [{transform_indices = @transform_0, window_bounds = array<i64: 1, 64, 48>}, {transform_indices = @transform_1, window_bounds = array<i64: 48, 128>}, {transform_indices = @transform_2, window_bounds = array<i64: 1, 128>}, {transform_indices = @transform_3, window_bounds = array<i64: 1, 64, 128>}]} {
    %c0 = arith.constant 0 : index
    %c0_0 = arith.constant 0 : index
    %c0_1 = arith.constant 0 : index
    %0 = vector.load %arg3[%c0, %c0_0, %c0_1] : memref<1x64x48xbf16, #tpu.memory_space<vmem>>, vector<1x64x48xbf16>
    %1 = vector.shape_cast %0 : vector<1x64x48xbf16> to vector<64x48xbf16>
    %c0_2 = arith.constant 0 : index
    %c0_3 = arith.constant 0 : index
    %2 = vector.load %arg4[%c0_2, %c0_3] : memref<48x128xbf16, #tpu.memory_space<vmem>>, vector<48x128xbf16>
    %cst = arith.constant dense<0.000000e+00> : vector<64x128xf32>
    %3 = tpu.matmul %1, %2, %cst {dimension_numbers = #tpu.dot_dimension_numbers<[1], [0], [0], [1], [0, 0, 1, 1], [], []>} : vector<64x48xbf16>, vector<48x128xbf16>, vector<64x128xf32> -> vector<64x128xf32>
    %c0_4 = arith.constant 0 : index
    %c0_5 = arith.constant 0 : index
    %4 = vector.load %arg5[%c0_4, %c0_5] : memref<1x128xf32, #tpu.memory_space<vmem>>, vector<1x128xf32>
    %5 = vector.broadcast %4 : vector<1x128xf32> to vector<64x128xf32>
    %6 = arith.addf %3, %5 : vector<64x128xf32>
    %c0_6 = arith.constant 0 : index
    %c0_7 = arith.constant 0 : index
    %c0_8 = arith.constant 0 : index
    %7 = vector.load %arg6[%c0_6, %c0_7, %c0_8] : memref<1x64x128xf32, #tpu.memory_space<vmem>>, vector<1x64x128xf32>
    %8 = vector.shape_cast %7 : vector<1x64x128xf32> to vector<64x128xf32>
    %9 = vector.shape_cast %6 : vector<64x128xf32> to vector<1x64x128xf32>
    tpu.vector_store %arg6[%c0_6, %c0_7, %c0_8], %9 {strides = array<i32>} : memref<1x64x128xf32, #tpu.memory_space<vmem>>, vector<1x64x128xf32>,
    return
  }
  func.func @transform_0(%arg0: i32, %arg1: i32, %arg2: i32) -> (i32, i32, i32) {
    %c0_i32 = arith.constant 0 : i32
    %c0_i32_0 = arith.constant 0 : i32
    return %arg0, %arg1, %c0_i32 : i32, i32, i32
  }
  func.func @transform_1(%arg0: i32, %arg1: i32, %arg2: i32) -> (i32, i32) {
    %c0_i32 = arith.constant 0 : i32
    %c0_i32_0 = arith.constant 0 : i32
    return %c0_i32, %arg2 : i32, i32
  }
  func.func @transform_2(%arg0: i32, %arg1: i32, %arg2: i32) -> (i32, i32) {
    %c0_i32 = arith.constant 0 : i32
    %c0_i32_0 = arith.constant 0 : i32
    return %c0_i32, %arg2 : i32, i32
  }
  func.func @transform_3(%arg0: i32, %arg1: i32, %arg2: i32) -> (i32, i32, i32) {
    %c0_i32 = arith.constant 0 : i32
    return %arg0, %arg1, %arg2 : i32, i32, i32
  }
}

</mosaic_0001>

<bundles_post_ra>
// kernel: downsample_layer.1
= control target key start
LH: loop header
LB: loop body
LE: loop exit
PB: predicated region body
PF: predicated region fallthrough
CT: control target
= control target key end

     0   :  { %s658_s12 = smov 0   ;;  %s660_s13 = smov 0   ;;  %s703_s0 = inlined_call_operand.vmem [shape: bf16[2,64,48], index: 0, kind: input, shape index: {}]   ;;  %s704_s1 = inlined_call_operand.vmem [shape: bf16[48,128], index: 1, kind: input, shape index: {}]   ;;  %s705_s2 = inlined_call_operand.vmem [shape: f32[1,128], index: 2, kind: input, shape index: {}]   ;;  %s706_s3 = inlined_call_operand.vmem [shape: f32[2,64,128], index: 3, kind: output, shape index: {}]  }
   0x1   :  { %s662_s14 = smov 0  }
   0x2 LB: > { %s32_s15 = sadd.s32 1, %s632_s13  ;;  %p535_p0 = scmp.ge.s32.totalorder %s636_s14, 1  ;;  %s636_s14 = sphi %s662_s14, %s13_s14   ;;  %s632_s13 = sphi %s660_s13, %s708_s13   ;;  %s628_s12 = sphi %s658_s12, %s707_s12  }
   0x3   : > { %p34_p1 = scmp.ge.s32.totalorder %s32_s15, 2  ;;  %p184_p2 = scmp.lt.s32.totalorder %s636_s14, 3 }
   0x5   : > { %s710_s15 = smov (%p34_p1, %s32_s15), 0  ;;  %p185_p3 = pnand %p535_p0, %p184_p2 }
   0x6   : > { %v607_v0 = vld [vmem:[%s704_s1] sm:$0xff] (!%p185_p3)   ;;  %p227_p4 = scmp.lt.s32.totalorder (!%p185_p3), %s628_s12, 1  ;;  %v608_v1 = vld [vmem:[%s704_s1 + $0x8] sm:$0xff] (!%p185_p3)   ;;  %v609_v2 = vld [vmem:[%s704_s1 + $0x10] sm:$0xff] (!%p185_p3)   ;;  %vm316_vm0 = vcmask (!%p185_p3), 392192  }
   0x7   : > { %188 = sbr.rel (%p185_p3) target bundleno = 237 (0xed), region = 32  ;;  %563 = vmatprep.subr.bf16.mxu0 (!%p185_p3), %v607_v0  ;;  %577 = vmatprep.subr.bf16.mxu1 (!%p185_p3), %v607_v0  ;;  %v540_v7 = vld [vmem:[%s705_s2] ss:$0 sm:$0xff] (!%p185_p3) }
   0x8   : > { %564 = vmatpush3.bf16.msra.mxu0 (!%p185_p3), %v607_v0  ;;  %580 = vmatpush3.bf16.msra.mxu1 (!%p185_p3), %v607_v0 }
   0x9   : > { %565 = vmatprep.subr.bf16.mxu0 (!%p185_p3), %v608_v1  ;;  %578 = vmatprep.subr.bf16.mxu1 (!%p185_p3), %v608_v1 }
   0xc   : > { %566 = vmatpush3.bf16.msra.mxu0 (!%p185_p3), %v608_v1  ;;  %581 = vmatpush3.bf16.msra.mxu1 (!%p185_p3), %v608_v1 }
   0xd   : > { %567 = vmatprep.subr.bf16.mxu0 (!%p185_p3), %v609_v2  ;;  %579 = vmatprep.subr.bf16.mxu1 (!%p185_p3), %v609_v2 }
   0xe   : > { %s712_s12 = smov (!%p227_p4, %s628_s12), 1 }
   0xf   : > { %s554_s22 = sshll.u32 %s712_s12, 5  ;;  %s555_s26 = sshll.u32 %s712_s12, 6 }
  0x10   : > { %s234_s25 = scalar_lea.vmem %s703_s0, %s554_s22  ;;  %568 = vmatpush3.bf16.msra.mxu0 %v609_v2  ;;  %582 = vmatpush3.bf16.msra.mxu1 %v609_v2  ;;  %s254_s4 = scalar_lea.vmem %s706_s3, %s555_s26 }
  0x11   : > { %v610_v3 = vld [vmem:[%s234_s25] sm:$0xff]   ;;  %v611_v4 = vld [vmem:[%s234_s25 + $0x10] sm:$0xff]   ;;  %v612_v5 = vld [vmem:[%s234_s25 + $0x8] sm:$0xff]  }
  0x12   : > { %569 = vmatprep.mubr.msk.bf16.mxu0 %vm316_vm0, %v610_v3  ;;  %573 = vmatprep.mubr.msk.bf16.mxu1 %vm316_vm0, %v611_v4  ;;  %v613_v6 = vld [vmem:[%s234_s25 + $0x18] sm:$0xff]  }
  0x13   : > { %570 = vmatmul.mubr.msk.bf16.vlgmr.msra.gmra.mrb[0].mxu0 %vm316_vm0, %v612_v5  ;;  %574 = vmatmul.mubr.msk.bf16.vlgmr.msra.gmra.mrb[0].mxu1 %vm316_vm0, %v613_v6 }
  0xe6   : > { %v571_v8 = vpop.f32.mrb[0].mxu0  ;;  %v575_v9 = vpop.f32.mrb[0].mxu1 }
  0xe7   : > { %v372_v10 = vadd.f32 %v571_v8, %v540_v7  ;;  %v388_v11 = vadd.f32 %v575_v9, %v540_v7  ;;  %v363_v12 = vpop.f32.mrb[1].mxu0  ;;  %v379_v13 = vpop.f32.mrb[1].mxu1 }
  0xe8   : > { %v364_v14 = vadd.f32 %v540_v7, %v363_v12  ;;  %v380_v15 = vadd.f32 %v540_v7, %v379_v13  ;;  %v572_v16 = vpop.f32.mrb[2].mxu0  ;;  %v576_v17 = vpop.f32.mrb[2].mxu1 }
  0xe9   : > { %396 = vst [vmem:[%s254_s4 + $0x10] sm:$0xff] %v372_v10  ;;  %400 = vst [vmem:[%s254_s4 + $0x30] sm:$0xff] %v388_v11  ;;  %v375_v18 = vadd.f32 %v572_v16, %v540_v7  ;;  %v391_v19 = vadd.f32 %v576_v17, %v540_v7  ;;  %v366_v20 = vpop.f32.mrb[3].mxu0  ;;  %v382_v21 = vpop.f32.mrb[3].mxu1 }
  0xea   : > { %394 = vst [vmem:[%s254_s4] sm:$0xff] %v364_v14  ;;  %398 = vst [vmem:[%s254_s4 + $0x20] sm:$0xff] %v380_v15  ;;  %v367_v22 = vadd.f32 %v540_v7, %v366_v20  ;;  %v383_v23 = vadd.f32 %v540_v7, %v382_v21 }
  0xeb   : > { %397 = vst [vmem:[%s254_s4 + $0x18] sm:$0xff] %v375_v18  ;;  %401 = vst [vmem:[%s254_s4 + $0x38] sm:$0xff] %v391_v19 }
  0xec   : > { %395 = vst [vmem:[%s254_s4 + $0x8] sm:$0xff] %v367_v22  ;;  %399 = vst [vmem:[%s254_s4 + $0x28] sm:$0xff] %v383_v23 }
  0xed PF: > { %s13_s14 = sadd.s32 1, %s636_s14   ;;  %s707_s12 = smov %s632_s13 }
  0xee   : > { %p10_p5 = scmp.ge.s32.totalorder %s13_s14, 4   ;;  %s708_s13 = smov %s710_s15 }
  0xf0   :  { %12 = sbr.rel (!%p10_p5) target bundleno = 2 (0x2), region = 68 }

</bundles_post_ra>
